<compile_context>
chip_gen: v5e
topology: v5e:2x2
jax: 0.10.0
libtpu: 0.0.40
codegen_flags: <defaults>
</compile_context>

<pallas_src>
import functools
import math

import jax
import jax.numpy as jnp
from jax import lax
from jax.experimental import pallas as pl
from jax.experimental.pallas import tpu as pltpu


def _round_up(x, m):
    return (x + m - 1) // m * m


def _pick_time_chunk(S, max_chunk=32):
    """Largest divisor of S that is <= max_chunk (so the grid tiles S exactly)."""
    for c in range(min(S, max_chunk), 0, -1):
        if S % c == 0:
            return c
    return 1


def _largest_aligned_divisor(total, max_tile, align):
    """Largest multiple of `align` that divides `total` and is <= max_tile."""
    best = align
    t = align
    while t <= min(total, max_tile):
        if total % t == 0:
            best = t
        t += align
    return best


# ---------------------------------------------------------------------------
# Tiled matmul + bias kernel (hoisted input projection and the fc head)
# ---------------------------------------------------------------------------
def matmul_bias_kernel(x_ref, w_ref, b_ref, o_ref, acc_ref):
    k = pl.program_id(2)

    @pl.when(k == 0)
    def _():
        acc_ref[...] = jnp.zeros_like(acc_ref)

    acc_ref[...] += jnp.dot(x_ref[...], w_ref[...],
                            preferred_element_type=jnp.float32)

    @pl.when(k == pl.num_programs(2) - 1)
    def _():
        o_ref[...] = (acc_ref[...] + b_ref[...]).astype(o_ref.dtype)


def matmul_bias_pallas(x, w_p, b_p, *, out_cols, out_dtype=jnp.float32,
                       tm=256, tn=256, tk=1024):
    """(N, K) @ (Kp, Vp) + (1, Vp) -> (N, out_cols) in out_dtype.

    `w_p` / `b_p` are expected to be pre-padded (multiples of 128) and bf16/f32
    respectively (done once in prepare_params).  Only the activation `x` is
    cast/padded here.  bf16 operands, f32 accumulation, tiles clamped to the
    (padded) problem so small problems do not over-pad.
    """
    N, K = x.shape
    Kp, Vp = w_p.shape
    assert Kp >= K and Kp % 128 == 0 and Vp % 128 == 0

    tm_eff = min(tm, _round_up(N, 8))
    tn_eff = _largest_aligned_divisor(Vp, tn, 128)
    tk_eff = _largest_aligned_divisor(Kp, tk, 128)
    Np = _round_up(N, tm_eff)

    xp = x.astype(jnp.bfloat16)
    if (Np, Kp) != (N, K):
        xp = jnp.pad(xp, ((0, Np - N), (0, Kp - K)))

    grid_spec = pltpu.PrefetchScalarGridSpec(
        num_scalar_prefetch=0,
        grid=(Np // tm_eff, Vp // tn_eff, Kp // tk_eff),
        in_specs=[
            pl.BlockSpec((tm_eff, tk_eff), lambda i, j, k: (i, k)),
            pl.BlockSpec((tk_eff, tn_eff), lambda i, j, k: (k, j)),
            pl.BlockSpec((1, tn_eff), lambda i, j, k: (0, j)),
        ],
        out_specs=pl.BlockSpec((tm_eff, tn_eff), lambda i, j, k: (i, j)),
        scratch_shapes=[pltpu.VMEM((tm_eff, tn_eff), jnp.float32)],
    )
    out = pl.pallas_call(
        matmul_bias_kernel,
        out_shape=jax.ShapeDtypeStruct((Np, Vp), out_dtype),
        grid_spec=grid_spec,
        compiler_params=pltpu.CompilerParams(
            dimension_semantics=("parallel", "parallel", "arbitrary")),
    )(xp, w_p, b_p)
    return out[:N, :out_cols]


# ---------------------------------------------------------------------------
# LSTM recurrence kernel: grid = (batch_split, time_chunks)
# ---------------------------------------------------------------------------
def lstm_chunk_kernel(gx_ref, whh_ref, h0_ref, c0_ref,
                      y_ref, hn_ref, cn_ref, h_scr, c_scr, *, unroll):
    """gx_ref: (T, Bb, 4H) bf16 precomputed x@W_ih^T + b for this chunk.

    Only the recurrent projection (Bb, H)@(H, 4H) remains inside the loop:
    bf16 operands, f32 accumulation, W_hh streamed from VMEM each step (not
    hoisted into a register-resident value).  PyTorch gate order (i, f, g, o);
    h/c state carried in f32 VMEM scratch.
    """
    t_chunk = pl.program_id(1)

    @pl.when(t_chunk == 0)
    def _():
        h_scr[...] = h0_ref[...]
        c_scr[...] = c0_ref[...]

    H = h_scr.shape[-1]
    T = gx_ref.shape[0]

    def step(t, carry):
        h = h_scr[...]
        c = c_scr[...]
        rec = jnp.dot(h.astype(jnp.bfloat16), whh_ref[...],
                      preferred_element_type=jnp.float32)
        gates = gx_ref[t].astype(jnp.float32) + rec
        i_g = jax.nn.sigmoid(gates[:, 0 * H:1 * H])
        f_g = jax.nn.sigmoid(gates[:, 1 * H:2 * H])
        g_g = jnp.tanh(gates[:, 2 * H:3 * H])
        o_g = jax.nn.sigmoid(gates[:, 3 * H:4 * H])
        c_new = f_g * c + i_g * g_g
        h_new = o_g * jnp.tanh(c_new)
        h_scr[...] = h_new
        c_scr[...] = c_new
        y_ref[t] = h_new.astype(y_ref.dtype)
        return carry

    lax.fori_loop(0, T, step, 0, unroll=unroll)

    # Final states written once, on the last time chunk of this batch split.
    @pl.when(t_chunk == pl.num_programs(1) - 1)
    def _():
        hn_ref[...] = h_scr[...]
        cn_ref[...] = c_scr[...]


def lstm_layer_pallas(gates_x, h0, c0, w_hh_t_bf16, *, n_bsplit=1,
                      max_time_chunk=32, unroll=8):
    """gates_x: (S, Bp, 4H) bf16, Bp a multiple of 8*n_bsplit.

    Returns (y (S, Bp, H) bf16, h_n (Bp, H) f32, c_n (Bp, H) f32).
    """
    S, Bp, G = gates_x.shape
    H = G // 4
    assert Bp % (8 * n_bsplit) == 0
    Bb = Bp // n_bsplit
    T = _pick_time_chunk(S, max_time_chunk)
    unroll_eff = max(1, min(unroll, T))

    # Explicit VMEM budget (review: budget W_hh residency for v7x's 64 MiB and
    # v5e's 16 MiB default scoped limit; bf16 W_hh already halves it).
    whh_b = H * 4 * H * 2 * 2            # bf16, double-buffered
    gx_b = T * Bb * 4 * H * 2 * 2
    y_b = T * Bb * H * 2 * 2
    state_b = 4 * Bb * H * 4 * 2
    scr_b = 2 * Bb * H * 4
    est = whh_b + gx_b + y_b + state_b + scr_b
    vmem_limit = int(min(max(2 * est, 32 * 1024 * 1024), 128 * 1024 * 1024))

    grid_spec = pltpu.PrefetchScalarGridSpec(
        num_scalar_prefetch=0,
        grid=(n_bsplit, S // T),
        in_specs=[
            pl.BlockSpec((T, Bb, G), lambda b, c: (c, b, 0)),   # gates_x chunk
            pl.BlockSpec((H, G), lambda b, c: (0, 0)),          # W_hh^T (bf16)
            pl.BlockSpec((Bb, H), lambda b, c: (b, 0)),         # h0 split
            pl.BlockSpec((Bb, H), lambda b, c: (b, 0)),         # c0 split
        ],
        out_specs=[
            pl.BlockSpec((T, Bb, H), lambda b, c: (c, b, 0)),   # y chunk (bf16)
            pl.BlockSpec((Bb, H), lambda b, c: (b, 0)),         # h_n
            pl.BlockSpec((Bb, H), lambda b, c: (b, 0)),         # c_n
        ],
        scratch_shapes=[pltpu.VMEM((Bb, H), jnp.float32),
                        pltpu.VMEM((Bb, H), jnp.float32)],
    )
    y, hn, cn = pl.pallas_call(
        functools.partial(lstm_chunk_kernel, unroll=unroll_eff),
        out_shape=(jax.ShapeDtypeStruct((S, Bp, H), jnp.bfloat16),
                   jax.ShapeDtypeStruct((Bp, H), jnp.float32),
                   jax.ShapeDtypeStruct((Bp, H), jnp.float32)),
        grid_spec=grid_spec,
        compiler_params=pltpu.CompilerParams(
            # batch split is independent (v7x megacore); time is serial.
            dimension_semantics=("parallel", "arbitrary"),
            vmem_limit_bytes=vmem_limit),
    )(gates_x, w_hh_t_bf16, h0, c0)
    return y, hn, cn


# ---------------------------------------------------------------------------
# Parameter preparation (one-time layout: transpose, pad, bf16 cast)
# ---------------------------------------------------------------------------
def prepare_params(params):
    V, E = params["embedding"].shape
    H = params["lstm"][0]["w_hh"].shape[1]
    Vp = _round_up(V, 128)
    Hp = _round_up(H, 128)

    fc_w_t = jnp.pad(params["fc_w"].T.astype(jnp.bfloat16),
                     ((0, Hp - H), (0, Vp - V)))                       # (Hp, Vp)
    fc_b = jnp.pad(params["fc_b"].astype(jnp.float32).reshape(1, V),
                   ((0, 0), (0, Vp - V)))                              # (1, Vp)

    prep = {
        "embedding": params["embedding"].astype(jnp.bfloat16),        # bf16 table
        "fc_w_t": fc_w_t,
        "fc_b": fc_b,
        "vocab_size": V,
        "hid_dim": H,
        "lstm": [],
    }
    Gp = _round_up(4 * H, 128)
    for p in params["lstm"]:
        in_dim = p["w_ih"].shape[1]
        Ip = _round_up(in_dim, 128)
        w_ih_t = jnp.pad(p["w_ih"].T.astype(jnp.bfloat16),
                         ((0, Ip - in_dim), (0, Gp - 4 * H)))          # (Ip, Gp)
        b = jnp.pad((p["b_ih"] + p["b_hh"]).astype(jnp.float32).reshape(1, -1),
                    ((0, 0), (0, Gp - 4 * H)))                         # (1, Gp)
        prep["lstm"].append({
            "w_ih_t": w_ih_t,
            "w_hh_t": p["w_hh"].T.astype(jnp.bfloat16),                # (H, 4H) bf16
            "b": b,
        })
    return prep


# ---------------------------------------------------------------------------
# Full forward (mirrors LSTMLanguageModel.forward, eval mode)
# ---------------------------------------------------------------------------
def lstm_language_model_forward(prep, src, hidden):
    # TODO(synk): nn.Dropout(0.65) is stochastic in training mode; eval-mode
    # identity is used here.
    h0, c0 = hidden                                     # (L, B, H) each
    B, S = src.shape
    H = prep["hid_dim"]

    # Batch split for the recurrence: use both v7x TensorCores when possible.
    n_split = 2 if _round_up(B, 8) >= 16 else 1
    Bp = _round_up(B, 8 * n_split)

    # Time-major embedding gather (no post-gather transpose), bf16 table.
    x_sm = prep["embedding"][src.T]                     # (S, B, E) bf16

    h_n, c_n = [], []
    for l, p in enumerate(prep["lstm"]):
        in_dim = x_sm.shape[-1]
        # Hoisted input projection at the TRUE batch size (no padded-row FLOPs).
        gates = matmul_bias_pallas(x_sm.reshape(S * B, in_dim),
                                   p["w_ih_t"], p["b"],
                                   out_cols=4 * H, out_dtype=jnp.bfloat16)
        gates = gates.reshape(S, B, 4 * H)
        if Bp != B:
            gates = jnp.pad(gates, ((0, 0), (0, Bp - B), (0, 0)))
            h0l = jnp.pad(h0[l], ((0, Bp - B), (0, 0)))
            c0l = jnp.pad(c0[l], ((0, Bp - B), (0, 0)))
        else:
            h0l, c0l = h0[l], c0[l]

        y, hl, cl = lstm_layer_pallas(gates, h0l, c0l, p["w_hh_t"],
                                      n_bsplit=n_split)
        h_n.append(hl[:B])
        c_n.append(cl[:B])
        x_sm = y[:, :B, :] if Bp != B else y            # (S, B, H) bf16
        # inter-layer LSTM dropout: identity in eval mode

    out = jnp.transpose(x_sm, (1, 0, 2)).reshape(B * S, H)   # (B*S, H) bf16
    logits = matmul_bias_pallas(out, prep["fc_w_t"], prep["fc_b"],
                                out_cols=prep["vocab_size"],
                                out_dtype=jnp.float32)
    prediction = logits.reshape(B, S, -1)               # (B, S, vocab) f32
    return prediction, (jnp.stack(h_n, 0), jnp.stack(c_n, 0))


# ---------------------------------------------------------------------------
# Deterministic parameter construction (shapes per nn.Embedding/LSTM/Linear)
# ---------------------------------------------------------------------------
def make_params(key, vocab_size, emb_dim, hid_dim, num_layers):
    init_emb = 0.1
    init_other = 1.0 / math.sqrt(hid_dim)
    keys = jax.random.split(key, 2 + 4 * num_layers)
    params = {
        "embedding": jax.random.uniform(
            keys[0], (vocab_size, emb_dim), jnp.float32, -init_emb, init_emb),
        "fc_w": jax.random.uniform(
            keys[1], (vocab_size, hid_dim), jnp.float32, -init_other, init_other),
        "fc_b": jnp.zeros((vocab_size,), jnp.float32),
        "lstm": [],
    }
    for l in range(num_layers):
        in_dim = emb_dim if l == 0 else hid_dim
        k = keys[2 + 4 * l: 2 + 4 * (l + 1)]
        params["lstm"].append({
            "w_ih": jax.random.uniform(k[0], (4 * hid_dim, in_dim),
                                       jnp.float32, -init_other, init_other),
            "w_hh": jax.random.uniform(k[1], (4 * hid_dim, hid_dim),
                                       jnp.float32, -init_other, init_other),
            "b_ih": jax.random.uniform(k[2], (4 * hid_dim,),
                                       jnp.float32, -init_other, init_other),
            "b_hh": jax.random.uniform(k[3], (4 * hid_dim,),
                                       jnp.float32, -init_other, init_other),
        })
    return params


# ---------------------------------------------------------------------------
# Pure-JAX reference (lax.scan LSTM, f32) for a numerical sanity check
# ---------------------------------------------------------------------------
def reference_forward(params, src, hidden):
    h0, c0 = hidden
    emb = params["embedding"][src]
    x = jnp.transpose(emb, (1, 0, 2))                   # (S, B, E)

    def layer(x_tm, p, h_init, c_init):
        H = h_init.shape[-1]

        def step(carry, x_t):
            h, c = carry
            gates = (x_t @ p["w_ih"].T + h @ p["w_hh"].T
                     + p["b_ih"] + p["b_hh"])
            i = jax.nn.sigmoid(gates[:, 0 * H:1 * H])
            f = jax.nn.sigmoid(gates[:, 1 * H:2 * H])
            g = jnp.tanh(gates[:, 2 * H:3 * H])
            o = jax.nn.sigmoid(gates[:, 3 * H:4 * H])
            c = f * c + i * g
            h = o * jnp.tanh(c)
            return (h, c), h

        (hf, cf), ys = lax.scan(step, (h_init, c_init), x_tm)
        return ys, hf, cf

    hs, cs = [], []
    for l, p in enumerate(params["lstm"]):
        x, hf, cf = layer(x, p, h0[l], c0[l])
        hs.append(hf)
        cs.append(cf)
    out = jnp.transpose(x, (1, 0, 2))
    pred = out @ params["fc_w"].T + params["fc_b"]
    return pred, (jnp.stack(hs, 0), jnp.stack(cs, 0))


if __name__ == "__main__":
    # Small shapes consistent with the module (scaled down from 1024/vocab).
    vocab_size, emb_dim, hid_dim, num_layers = 256, 128, 128, 2
    batch, seq = 2, 8

    key = jax.random.PRNGKey(0)
    kp, ks = jax.random.split(key)
    params = make_params(kp, vocab_size, emb_dim, hid_dim, num_layers)
    prep = prepare_params(params)                       # one-time weight layout

    src = jax.random.randint(ks, (batch, seq), 0, vocab_size, jnp.int32)
    hidden = (jnp.zeros((num_layers, batch, hid_dim), jnp.float32),
              jnp.zeros((num_layers, batch, hid_dim), jnp.float32))

    pred, (h_n, c_n) = lstm_language_model_forward(prep, src, hidden)
    jax.block_until_ready(pred)
    jax.block_until_ready(h_n)
    jax.block_until_ready(c_n)

    pred_ref, (h_ref, c_ref) = reference_forward(params, src, hidden)
    assert pred.shape == (batch, seq, vocab_size)
    assert h_n.shape == (num_layers, batch, hid_dim)
    assert c_n.shape == (num_layers, batch, hid_dim)
    assert jnp.allclose(pred, pred_ref, atol=2e-2, rtol=2e-2)
    assert jnp.allclose(h_n, h_ref, atol=2e-2, rtol=2e-2)
    assert jnp.allclose(c_n, c_ref, atol=2e-2, rtol=2e-2)

    print("KERNEL_OK")
</pallas_src>

<mosaic_0001>
module attributes {stable_mosaic.version = 11 : i64} {
  func.func @matmul_bias_kernel(%arg0: i32, %arg1: i32, %arg2: i32, %arg3: memref<16x128xbf16, #tpu.memory_space<vmem>>, %arg4: memref<128x256xbf16, #tpu.memory_space<vmem>>, %arg5: memref<1x256xf32, #tpu.memory_space<vmem>>, %arg6: memref<16x256xbf16, #tpu.memory_space<vmem>>, %arg7: memref<16x256xf32, #tpu.memory_space<vmem>>) attributes {dimension_semantics = [#tpu.dimension_semantics<parallel>, #tpu.dimension_semantics<parallel>, #tpu.dimension_semantics<arbitrary>], iteration_bounds = array<i64: 1, 2, 1>, scalar_prefetch = 0 : i64, scratch_operands = 1 : i64, tpu.core_type = #tpu.core_type<tc>, window_params = [{transform_indices = @transform_0, window_bounds = array<i64: 16, 128>}, {transform_indices = @transform_1, window_bounds = array<i64: 128, 256>}, {transform_indices = @transform_2, window_bounds = array<i64: 1, 256>}, {transform_indices = @transform_3, window_bounds = array<i64: 16, 256>}]} {
    %c0_i32 = arith.constant 0 : i32
    %0 = arith.cmpi eq, %arg2, %c0_i32 : i32
    %1 = arith.extui %0 : i1 to i32
    %c0_i32_0 = arith.constant 0 : i32
    %2 = arith.cmpi ne, %1, %c0_i32_0 : i32
    scf.if %2 {
      %cst_10 = arith.constant 0.000000e+00 : f32
      %12 = vector.broadcast %cst_10 : f32 to vector<16x256xf32>
      %c0_11 = arith.constant 0 : index
      %c0_12 = arith.constant 0 : index
      %13 = vector.load %arg7[%c0_11, %c0_12] : memref<16x256xf32, #tpu.memory_space<vmem>>, vector<16x256xf32>
      tpu.vector_store %arg7[%c0_11, %c0_12], %12 {strides = array<i32>} : memref<16x256xf32, #tpu.memory_space<vmem>>, vector<16x256xf32>,
    } else {
    }
    %c0 = arith.constant 0 : index
    %c0_1 = arith.constant 0 : index
    %3 = vector.load %arg7[%c0, %c0_1] : memref<16x256xf32, #tpu.memory_space<vmem>>, vector<16x256xf32>
    %c0_2 = arith.constant 0 : index
    %c0_3 = arith.constant 0 : index
    %4 = vector.load %arg3[%c0_2, %c0_3] : memref<16x128xbf16, #tpu.memory_space<vmem>>, vector<16x128xbf16>
    %c0_4 = arith.constant 0 : index
    %c0_5 = arith.constant 0 : index
    %5 = vector.load %arg4[%c0_4, %c0_5] : memref<128x256xbf16, #tpu.memory_space<vmem>>, vector<128x256xbf16>
    %cst = arith.constant dense<0.000000e+00> : vector<16x256xf32>
    %6 = tpu.matmul %4, %5, %cst {dimension_numbers = #tpu.dot_dimension_numbers<[1], [0], [0], [1], [0, 0, 1, 1], [], []>} : vector<16x128xbf16>, vector<128x256xbf16>, vector<16x256xf32> -> vector<16x256xf32>
    %7 = arith.addf %3, %6 : vector<16x256xf32>
    %c0_6 = arith.constant 0 : index
    %c0_7 = arith.constant 0 : index
    %8 = vector.load %arg7[%c0_6, %c0_7] : memref<16x256xf32, #tpu.memory_space<vmem>>, vector<16x256xf32>
    tpu.vector_store %arg7[%c0_6, %c0_7], %7 {strides = array<i32>} : memref<16x256xf32, #tpu.memory_space<vmem>>, vector<16x256xf32>,
    %c0_i32_8 = arith.constant 0 : i32
    %9 = arith.cmpi eq, %arg2, %c0_i32_8 : i32
    %10 = arith.extui %9 : i1 to i32
    %c0_i32_9 = arith.constant 0 : i32
    %11 = arith.cmpi ne, %10, %c0_i32_9 : i32
    scf.if %11 {
      %c0_10 = arith.constant 0 : index
      %c0_11 = arith.constant 0 : index
      %12 = vector.load %arg7[%c0_10, %c0_11] : memref<16x256xf32, #tpu.memory_space<vmem>>, vector<16x256xf32>
      %c0_12 = arith.constant 0 : index
      %c0_13 = arith.constant 0 : index
      %13 = vector.load %arg5[%c0_12, %c0_13] : memref<1x256xf32, #tpu.memory_space<vmem>>, vector<1x256xf32>
      %14 = vector.broadcast %13 : vector<1x256xf32> to vector<16x256xf32>
      %15 = arith.addf %12, %14 : vector<16x256xf32>
      %16 = arith.truncf %15 : vector<16x256xf32> to vector<16x256xbf16>
      %c0_14 = arith.constant 0 : index
      %c0_15 = arith.constant 0 : index
      %17 = vector.load %arg6[%c0_14, %c0_15] : memref<16x256xbf16, #tpu.memory_space<vmem>>, vector<16x256xbf16>
      tpu.vector_store %arg6[%c0_14, %c0_15], %16 {strides = array<i32>} : memref<16x256xbf16, #tpu.memory_space<vmem>>, vector<16x256xbf16>,
    } else {
    }
    return
  }
  func.func @transform_0(%arg0: i32, %arg1: i32, %arg2: i32) -> (i32, i32) {
    %c0_i32 = arith.constant 0 : i32
    return %arg0, %arg2 : i32, i32
  }
  func.func @transform_1(%arg0: i32, %arg1: i32, %arg2: i32) -> (i32, i32) {
    %c0_i32 = arith.constant 0 : i32
    return %arg2, %arg1 : i32, i32
  }
  func.func @transform_2(%arg0: i32, %arg1: i32, %arg2: i32) -> (i32, i32) {
    %c0_i32 = arith.constant 0 : i32
    %c0_i32_0 = arith.constant 0 : i32
    return %c0_i32, %arg1 : i32, i32
  }
  func.func @transform_3(%arg0: i32, %arg1: i32, %arg2: i32) -> (i32, i32) {
    %c0_i32 = arith.constant 0 : i32
    return %arg0, %arg1 : i32, i32
  }
}

</mosaic_0001>

<bundles_post_ra>
// kernel: tpu_custom_call.1
= control target key start
LH: loop header
LB: loop body
LE: loop exit
PB: predicated region body
PF: predicated region fallthrough
CT: control target
= control target key end

     0   :  { %s1213_s0 = inlined_call_operand.hbm [shape: bf16[16,128], index: 0, kind: input, shape index: {}]   ;;  %s1214_s1 = inlined_call_operand.hbm [shape: bf16[128,512], index: 1, kind: input, shape index: {}]   ;;  %s1215_s2 = inlined_call_operand.hbm [shape: f32[1,512], index: 2, kind: input, shape index: {}]   ;;  %s1216_s3 = inlined_call_operand.hbm [shape: bf16[16,512], index: 3, kind: output, shape index: {}]  }
   0x1   :  { %1217 = sst [smem:[#allocation13_spill]] %s1213_s0 }
   0x2   :  { %1218 = sst [smem:[#allocation14_spill]] %s1214_s1 }
   0x3   :  { %8 = vsyncpa [#allocation4], 0 }
   0x4   :  { %9 = vsyncpa [#allocation7], 0 }
   0x5   :  { %11 = vsyncpa [#allocation7 + $0x1], 0 }
   0x6   :  { %12 = vsyncpa [#allocation5], 0 }
   0x7   :  { %14 = vsyncpa [#allocation5 + $0x1], 0  ;;  %s1005_s12 = smov 0   ;;  %s1007_s13 = smov 0  }
   0x8   :  { %s1009_s14 = smov 0   ;;  %s1011_s15 = smov 0  }
   0x9   :  { %s1013_s16 = smov 0   ;;  %s1015_s17 = smov 0  }
   0xa LB: > { %s35_s18 = sadd.s32 1, %s970_s16  ;;  %s76_s19 = sadd.s32 1, %s962_s14  ;;  %s974_s17 = sphi %s1015_s17, %s20_s17   ;;  %s970_s16 = sphi %s1013_s16, %s1231_s16   ;;  %s966_s15 = sphi %s1011_s15, %s1230_s15   ;;  %s962_s14 = sphi %s1009_s14, %s1229_s14   ;;  %s958_s13 = sphi %s1007_s13, %s1228_s13   ;;  %s954_s12 = sphi %s1005_s12, %s1227_s12  }
   0xb   : > { %p37_p0 = scmp.ge.s32.totalorder %s35_s18, 2  ;;  %p83_p1 = scmp.ne.s32.totalorder %s962_s14, %s958_s13 }
   0xc   : > { %p84_p2 = scmp.eq.s32.totalorder %s974_s17, 0  ;;  %p609_p3 = scmp.ge.s32.totalorder %s974_s17, 2 }
   0xd   : > { %s1233_s18 = smov (%p37_p0, %s35_s18), 0  ;;  %p738_p5 = scmp.lt.s32.totalorder %s974_s17, 2 }
   0xe   : > { %p1046_p4 = por %p84_p2, %p83_p1  ;;  %s72_s21 = ssub.s32 %s970_s16, %s1233_s18 }
   0xf   : > { %s185_s22 = sand.u32 1, %s974_s17   ;;  %p74_p6 = scmp.eq.s32.totalorder %s72_s21, 0 }
  0x10   : > { %s187_s23 = sand.u32 1, %s962_s14   ;;  %s693_s24 = sshll.u32 %s970_s16, 3 }
  0x11   : > { %s1057_s25 = scalar_select %p74_p6, %s962_s14, %s76_s19  }
  0x12   : > { %s610_s26 = sshll.u32 %s187_s23, 7  ;;  %s1220_s1 = sld [smem:[#allocation14_spill]] }
  0x13   : > { %s189_s4 = scalar_lea.vmem [#allocation6], %s610_s26  ;;  %p1068_p7 = pnand %p738_p5, %p1046_p4 }
  0x14   : > { %s200_s5 = sshll.u32 %s189_s4, 4  ;;  %s1072_s7 = scalar_lea.sflag [#allocation7], %s185_s22  ;;  %s201_s5 = int_to_ptr.vmem [resolvable:$true] %s200_s5 }
  0x15   : > { %s976_s8 = smov 256   ;;  %s977_s9 = smov 128  }
  0x16   : > { %s978_s10 = smov 8   ;;  %s1078_s11 = sadd.s32 4294967295, %s974_s17  }
  0x17   : > { %s606_s19 = sadd.s32 4294967294, %s974_s17   ;;  %p89_p8 = scmp.ne.s32.totalorder %s958_s13, %s954_s12 }
  0x18   : > { %s197_s29 = scalar_lea.hbm %s1220_s1, %s693_s24  ;;  %p90_p9 = scmp.eq.s32.totalorder %s1078_s11, 0 }
  0x19   : > { %s198_s30 = sshll.u32 %s197_s29, 4  ;;  %p141_p10 = scmp.eq.s32.totalorder %s1078_s11, 1  ;;  %s199_s30 = int_to_ptr.hbm [resolvable:$true] %s198_s30 }
  0x1a   : > { %729 = dma.hbm_to_vmem [thread:$0]  (!%p1068_p7), %s199_s30, 2048, %s201_s5, %s1072_s7, %s976_s8, %s977_s9, %s978_s10  }
  0x1b   : > { %p147_p11 = scmp.eq.s32.totalorder %s606_s19, 1  ;;  %p1087_p12 = por %p90_p9, %p89_p8 }
  0x1c   : > { %p607_p13 = scmp.ge.s32.totalorder %s974_s17, 1  ;;  %p1095_p0 = por %p141_p10, %p83_p1 }
  0x1d   : > { %p1099_p2 = por %p147_p11, %p89_p8  ;;  %p154_p4 = scmp.lt.s32.totalorder %s974_s17, 3 }
  0x1e   : > { %s1225_s0 = sld [smem:[#allocation13_spill]]  ;;  %s979_s29 = smov [#allocation3]  }
  0x1f   : > { %p1107_p5 = pnand %p607_p13, %p154_p4  ;;  %s171_s30 = sshll.u32 %s979_s29, 4  ;;  %s172_s30 = int_to_ptr.vmem [resolvable:$true] %s171_s30 }
  0x20   : > { %s613_s4 = sshll.u32 %s187_s23, 1  ;;  %s614_s5 = sshll.u32 %s970_s16, 1 }
  0x21   : > { %p722_p1 = pneg %p1107_p5  ;;  %s214_s8 = scalar_lea.vmem [#allocation8], %s613_s4 }
  0x22   : > { %s222_s9 = sshll.u32 %s214_s8, 4  ;;  %s218_s24 = scalar_lea.hbm %s1215_s2, %s614_s5  ;;  %s223_s9 = int_to_ptr.vmem [resolvable:$true] %s222_s9 }
  0x23   : > { %p723_p6 = pnand %p722_p1, %p90_p9  ;;  %s980_s26 = smov 64  }
  0x24   : > { %s169_s27 = sshll.u32 %s1225_s0, 4  ;;  %s981_s0 = smov 4   ;;  %s170_s27 = int_to_ptr.hbm [resolvable:$true] %s169_s27 }
  0x25   : > { %725 = dma.hbm_to_vmem [thread:$0]  (!%p723_p6), %s170_s27, 128, %s172_s30, [#allocation4], %s980_s26, %s980_s26, %s981_s0  }
  0x26   : > { %s220_s1 = sshll.u32 %s218_s24, 4  ;;  %231 = sbr.rel (%p1107_p5) target bundleno = 226 (0xe2), region = 32  ;;  %s221_s1 = int_to_ptr.hbm [resolvable:$true] %s220_s1 }
  0x27   : > { %732 = dma.hbm_to_vmem [thread:$0]  (!%p1068_p7), %s221_s1, 32, %s223_s9, %s1072_s7  }
  0x2b   : > { %941 = dma.done.wait (%p90_p9), [#allocation4], 128  }
  0x2c   : > { %943 = vsyncadd (%p90_p9), [#allocation4], 4294967168  ;;  %s238_s23 = sand.u32 1, %s1078_s11   ;;  %s1132_s29 = sand.u32 1, %s958_s13  }
  0x2d   : > { %s617_s0 = sshll.u32 %s1132_s29, 7  ;;  %s239_s27 = scalar_lea.sflag [#allocation7], %s238_s23 }
  0x2e   : > { %s1135_s6 = scalar_lea.vmem [#allocation6], %s617_s0 }
  0x2f   : > { %945 = dma.done.wait (%p1087_p12), %s239_s27, 2080  }
  0x30   : > { %947 = vsyncadd (%p1087_p12), %s239_s27, 4294965216  ;;  %v682_v0 = vld [vmem:[%s1135_s6 + $0x70] sm:$0xf]  ;;  %v710_v1 = vld [vmem:[%s1135_s6 + $0x74] sm:$0xf0]  ;;  %s618_s1 = sshll.u32 %s1132_s29, 1 }
  0x31   : > { %v709_v2 = vld [vmem:[%s1135_s6 + $0x74] sm:$0xf]  ;;  %v683_v3 = vor.u32 %v710_v1, %v682_v0  ;;  %v684_v4 = vld [vmem:[%s1135_s6 + $0x78] sm:$0xf0]  ;;  %v674_v5 = vld [vmem:[%s1135_s6 + $0x60] sm:$0xf] }
  0x32   : > { %v708_v6 = vld [vmem:[%s1135_s6 + $0x64] sm:$0xf0]  ;;  %v687_v7 = vor.u32 %v709_v2, %v684_v4  ;;  %v707_v8 = vld [vmem:[%s1135_s6 + $0x64] sm:$0xf]  ;;  %v676_v9 = vld [vmem:[%s1135_s6 + $0x68] sm:$0xf0] }
  0x33   : > { %403 = vmatpush.bf16.msra.mxu0 %v683_v3  ;;  %v675_v10 = vor.u32 %v708_v6, %v674_v5  ;;  %v679_v11 = vor.u32 %v707_v8, %v676_v9  ;;  %v666_v12 = vld [vmem:[%s1135_s6 + $0x50] sm:$0xf]  ;;  %v706_v13 = vld [vmem:[%s1135_s6 + $0x54] sm:$0xf0]  ;;  %v705_v14 = vld [vmem:[%s1135_s6 + $0x54] sm:$0xf] }
  0x34   : > { %417 = vmatpush.bf16.msra.mxu1 %v687_v7  ;;  %v668_v15 = vld [vmem:[%s1135_s6 + $0x58] sm:$0xf0]  ;;  %v667_v16 = vor.u32 %v706_v13, %v666_v12  ;;  %v658_v18 = vld [vmem:[%s1135_s6 + $0x40] sm:$0xf]  ;;  %v704_v19 = vld [vmem:[%s1135_s6 + $0x44] sm:$0xf0] }
  0x35   : > { %v671_v17 = vor.u32 %v705_v14, %v668_v15  ;;  %v703_v20 = vld [vmem:[%s1135_s6 + $0x44] sm:$0xf]  ;;  %v660_v21 = vld [vmem:[%s1135_s6 + $0x48] sm:$0xf0]  ;;  %v659_v22 = vor.u32 %v704_v19, %v658_v18  ;;  %v650_v24 = vld [vmem:[%s1135_s6 + $0x30] sm:$0xf] }
  0x36   : > { %v663_v23 = vor.u32 %v703_v20, %v660_v21  ;;  %v702_v25 = vld [vmem:[%s1135_s6 + $0x34] sm:$0xf0]  ;;  %v701_v26 = vld [vmem:[%s1135_s6 + $0x34] sm:$0xf]  ;;  %v652_v27 = vld [vmem:[%s1135_s6 + $0x38] sm:$0xf0] }
  0x37   : > { %404 = vmatpush.bf16.msra.mxu0 %v675_v10  ;;  %v651_v28 = vor.u32 %v702_v25, %v650_v24  ;;  %v655_v29 = vor.u32 %v701_v26, %v652_v27  ;;  %v642_v30 = vld [vmem:[%s1135_s6 + $0x20] sm:$0xf]  ;;  %v700_v31 = vld [vmem:[%s1135_s6 + $0x24] sm:$0xf0]  ;;  %v699_v32 = vld [vmem:[%s1135_s6 + $0x24] sm:$0xf] }
  0x38   : > { %418 = vmatpush.bf16.msra.mxu1 %v679_v11  ;;  %v644_v33 = vld [vmem:[%s1135_s6 + $0x28] sm:$0xf0]  ;;  %v643_v34 = vor.u32 %v700_v31, %v642_v30  ;;  %v634_v36 = vld [vmem:[%s1135_s6 + $0x10] sm:$0xf]  ;;  %v698_v37 = vld [vmem:[%s1135_s6 + $0x14] sm:$0xf0] }
  0x39   : > { %v647_v35 = vor.u32 %v699_v32, %v644_v33  ;;  %v697_v38 = vld [vmem:[%s1135_s6 + $0x14] sm:$0xf]  ;;  %v636_v39 = vld [vmem:[%s1135_s6 + $0x18] sm:$0xf0]  ;;  %v635_v40 = vor.u32 %v698_v37, %v634_v36  ;;  %v626_v42 = vld [vmem:[%s1135_s6] sm:$0xf] }
  0x3a   : > { %v639_v41 = vor.u32 %v697_v38, %v636_v39  ;;  %v696_v43 = vld [vmem:[%s1135_s6 + $0x4] sm:$0xf0]  ;;  %v695_v44 = vld [vmem:[%s1135_s6 + $0x4] sm:$0xf]  ;;  %v628_v45 = vld [vmem:[%s1135_s6 + $0x8] sm:$0xf0] }
  0x3b   : > { %405 = vmatpush.bf16.msra.mxu0 %v667_v16  ;;  %v627_v46 = vor.u32 %v696_v43, %v626_v42  ;;  %v631_v47 = vor.u32 %v695_v44, %v628_v45  ;;  %v694_v48 = vld [vmem:[#allocation3] sm:$0xff]  ;;  %s252_s7 = scalar_lea.vmem [#allocation8], %s618_s1  ;;  %s619_s11 = sshll.u32 %s1132_s29, 4 }
  0x3c   : > { %419 = vmatpush.bf16.msra.mxu1 %v671_v17  ;;  %v446_v49 = vld [vmem:[%s252_s7] sm:$0x3]  ;;  %s711_s20 = sshll.u32 %s966_s15, 3  ;;  %s280_s5 = scalar_lea.vmem [#allocation9], %s619_s11 }
  0x3d   : > { %v448_v50 = vperm.slane %v446_v49, 0  ;;  %v449_v51 = vperm.slane %v446_v49, 1  ;;  %s475_s4 = scalar_lea.hbm %s1216_s3, %s711_s20  ;;  %s476_s8 = sshll.u32 %s280_s5, 4  ;;  %s477_s8 = int_to_ptr.vmem [resolvable:$true] %s476_s8 }
  0x3e   : > { %s478_s9 = sshll.u32 %s475_s4, 4  ;;  %s461_s10 = scalar_lea.sflag [#allocation5], %s1132_s29  ;;  %s479_s9 = int_to_ptr.hbm [resolvable:$true] %s478_s9 }
  0x3f   : > { %406 = vmatpush.bf16.msra.mxu0 %v659_v22  ;;  %s902_s15 = sshra.s32 %s479_s9, 4  ;;  %s908_s23 = scalar_lea.hbm %s1216_s3, 32  ;;  %s903_s15 = int_to_ptr.hbm [resolvable:$true] %s902_s15 }
  0x40   : > { %420 = vmatpush.bf16.msra.mxu1 %v663_v23  ;;  %s904_s19 = scalar_lea.hbm %s903_s15, 16  ;;  %p909_p10 = scmp.lt.s32.totalorder %s903_s15, %s1216_s3 }
  0x41   : > { %p905_p7 = scmp.ne.s32.totalorder %s903_s15, %s904_s19  ;;  %p910_p11 = scmp.lt.s32.totalorder %s908_s23, %s904_s19 }
  0x43   : > { %407 = vmatpush.bf16.msra.mxu0 %v651_v28  ;;  %p906_p8 = pnand %p905_p7, %p1095_p0  ;;  %p911_p12 = por %p910_p11, %p909_p10 }
  0x44   : > { %421 = vmatpush.bf16.msra.mxu1 %v655_v29 }
  0x45   : > { %p907_p9 = pneg %p906_p8 }
  0x47   : > { %408 = vmatpush.bf16.msra.mxu0 %v643_v34  ;;  %p912_p13 = pnand %p911_p12, %p907_p9 }
  0x48   : > { %422 = vmatpush.bf16.msra.mxu1 %v647_v35 }
  0x4b   : > { %409 = vmatpush.bf16.msra.mxu0 %v635_v40 }
  0x4c   : > { %423 = vmatpush.bf16.msra.mxu1 %v639_v41 }
  0x4f   : > { %410 = vmatpush.bf16.msra.mxu0 %v627_v46 }
  0x50   : > { %424 = vmatpush.bf16.msra.mxu1 %v631_v47 }
  0x52   : > { %411 = vmatmul.bf16.vlgmr.msra.gmra.mxu0 %v694_v48 }
  0x53   : > { %425 = vmatmul.bf16.vlgmr.msra.gmra.mxu1 %v694_v48 }
  0xcf   : > { %v412_v52 = vpop.f32.mrf.mxu0 }
  0xd0   : > { %v452_v53 = vadd.f32 %v448_v50, %v412_v52  ;;  %v426_v54 = vpop.f32.mrf.mxu1 }
  0xd1   : > { %v453_v55 = vadd.f32 %v449_v51, %v426_v54 }
  0xd3   : > { %v456_v56 = vpack.c.bf16 %v453_v55, %v452_v53 }
  0xd5   : > { %458 = vst [vmem:[%s280_s5] sm:$0xff] %v456_v56 }
  0xd7   : > { %v414_v57 = vpop.f32.mrf.mxu0 }
  0xd8   : > { %v454_v58 = vadd.f32 %v448_v50, %v414_v57  ;;  %v428_v59 = vpop.f32.mrf.mxu1 }
  0xd9   : > { %v455_v60 = vadd.f32 %v449_v51, %v428_v59 }
  0xdb   : > { %v457_v61 = vpack.c.bf16 %v455_v60, %v454_v58 }
  0xdd   : > { %459 = vst [vmem:[%s280_s5 + $0x8] sm:$0xff] %v457_v61 }
  0xde   : > { %915 = shalt.err (!%p912_p13)
}
  0xdf   : > { %s982_s29 = smov 128   ;;  %s983_s6 = smov 256  }
  0xe0   : > { %s984_s1 = smov 8  }
  0xe1   : > { %720 = dma.vmem_to_hbm [thread:$0]  (%p1095_p0), %s477_s8, 256, %s479_s9, %s461_s10, %s982_s29, %s983_s6, %s984_s1  }
  0xe2 PF: > { %s493_s7 = sand.u32 1, %s954_s12   ;;  %p734_p4 = pnand %p609_p3, %p1099_p2 }
  0xe3   : > { %s494_s11 = scalar_lea.sflag [#allocation5], %s493_s7 }
  0xe4   : > { %p735_p5 = pneg %p734_p4 }
  0xe6   : > { %949 = dma.done.wait (%p735_p5), %s494_s11, 256  }
  0xe7   : > { %951 = vsyncadd (%p735_p5), %s494_s11, 4294967040  ;;  %s20_s17 = sadd.s32 1, %s974_s17   ;;  %s1227_s12 = smov %s958_s13 }
  0xe8   : > { %p17_p1 = scmp.ge.s32.totalorder %s20_s17, 4   ;;  %s1228_s13 = smov %s962_s14 }
  0xe9   : > { %s1229_s14 = smov %s1057_s25  ;;  %s1230_s15 = smov %s970_s16 }
  0xea   : > { %s1231_s16 = smov %s1233_s18  ;;  %19 = sbr.rel (!%p17_p1) target bundleno = 10 (0xa), region = 102 }
  0xef   :  { %500 = vsyncpa [#allocation4], 1 }
  0xf0   :  { %502 = vsyncpa [#allocation4 + $0x1], 1 }
  0xf1   :  { %503 = vsyncpa [#allocation7], 1 }
  0xf2   :  { %505 = vsyncpa [#allocation7 + $0x1], 1 }
  0xf3   :  { %506 = vsyncpa [#allocation5], 1 }
  0xf4   :  { %508 = vsyncpa [#allocation5 + $0x1], 1 }

</bundles_post_ra>
